<compile_context>
chip_gen: v5e
topology: v5e:2x2
jax: 0.10.0
libtpu: 0.0.40
codegen_flags: <defaults>
</compile_context>

<pallas_src>
import jax
import jax.numpy as jnp
from jax.experimental import pallas as pl
from jax.experimental.pallas import tpu as pltpu

LANE = 512            # lane-dense width, multiple of 128
MAX_TILE_ROWS = 1024  # 1024 x 512 x 4B = 2 MiB per block (8 MiB double-buffered)


def _elem_arith_kernel(x_ref, o_ref):
    # Full op chain reduces exactly to 2*x + 2 (mul/div by 2 are exact in fp).
    x = x_ref[...]
    o_ref[...] = x + x + 2.0


def _round_up(a: int, b: int) -> int:
    return ((a + b - 1) // b) * b


def elementary_arithmetic(x: jax.Array) -> jax.Array:
    orig_shape = x.shape
    orig_dtype = x.dtype
    total = x.size

    # Lane-dense 2D view of the flat buffer, padded so the row count is a
    # multiple of the tile rows (tile rows always a multiple of 8 for f32).
    rows = _round_up(pl.cdiv(total, LANE), 8)
    tile_rows = min(MAX_TILE_ROWS, rows)
    rows = _round_up(rows, tile_rows)
    padded_total = rows * LANE

    flat = x.reshape(-1)
    if padded_total != total:
        flat = jnp.pad(flat, (0, padded_total - total))
    x2d = flat.reshape(rows, LANE)

    grid = (rows // tile_rows,)

    out2d = pl.pallas_call(
        _elem_arith_kernel,
        out_shape=jax.ShapeDtypeStruct((rows, LANE), orig_dtype),
        grid=grid,
        in_specs=[pl.BlockSpec((tile_rows, LANE), lambda i: (i, 0))],
        out_specs=pl.BlockSpec((tile_rows, LANE), lambda i: (i, 0)),
        compiler_params=pltpu.CompilerParams(
            dimension_semantics=("parallel",),
        ),
    )(x2d)

    out_flat = out2d.reshape(-1)
    if padded_total != total:
        out_flat = out_flat[:total]
    return out_flat.reshape(orig_shape)


if __name__ == "__main__":
    key = jax.random.PRNGKey(0)
    # NCHW input consistent with the module's 4D reshapes.
    x = jax.random.normal(key, (2, 4, 16, 16), dtype=jnp.float32)

    out = elementary_arithmetic(x)
    out = jax.block_until_ready(out)

    # Reference: the forward collapses to 2*x + 2.
    ref = 2.0 * x + 2.0
    assert out.shape == x.shape and out.dtype == x.dtype
    assert jnp.allclose(out, ref, atol=1e-6), "mismatch vs reference"

    print("KERNEL_OK")
</pallas_src>

<mosaic_0001>
module attributes {stable_mosaic.version = 11 : i64} {
  func.func @_elem_arith_kernel(%arg0: i32, %arg1: memref<8x512xf32, #tpu.memory_space<vmem>>, %arg2: memref<8x512xf32, #tpu.memory_space<vmem>>) attributes {dimension_semantics = [#tpu.dimension_semantics<parallel>], iteration_bounds = array<i64: 1>, scalar_prefetch = 0 : i64, scratch_operands = 0 : i64, tpu.core_type = #tpu.core_type<tc>, window_params = [{transform_indices = @transform_0, window_bounds = array<i64: 8, 512>}, {transform_indices = @transform_1, window_bounds = array<i64: 8, 512>}]} {
    %c0 = arith.constant 0 : index
    %c0_0 = arith.constant 0 : index
    %0 = vector.load %arg1[%c0, %c0_0] : memref<8x512xf32, #tpu.memory_space<vmem>>, vector<8x512xf32>
    %1 = arith.addf %0, %0 : vector<8x512xf32>
    %cst = arith.constant 2.000000e+00 : f32
    %2 = vector.broadcast %cst : f32 to vector<8x512xf32>
    %3 = arith.addf %1, %2 : vector<8x512xf32>
    %c0_1 = arith.constant 0 : index
    %c0_2 = arith.constant 0 : index
    %4 = vector.load %arg2[%c0_1, %c0_2] : memref<8x512xf32, #tpu.memory_space<vmem>>, vector<8x512xf32>
    tpu.vector_store %arg2[%c0_1, %c0_2], %3 {strides = array<i32>} : memref<8x512xf32, #tpu.memory_space<vmem>>, vector<8x512xf32>,
    return
  }
  func.func @transform_0(%arg0: i32) -> (i32, i32) {
    %c0_i32 = arith.constant 0 : i32
    %c0_i32_0 = arith.constant 0 : i32
    return %arg0, %c0_i32 : i32, i32
  }
  func.func @transform_1(%arg0: i32) -> (i32, i32) {
    %c0_i32 = arith.constant 0 : i32
    %c0_i32_0 = arith.constant 0 : i32
    return %arg0, %c0_i32 : i32, i32
  }
}

</mosaic_0001>

<bundles_post_ra>
// kernel: tpu_custom_call.1
= control target key start
LH: loop header
LB: loop body
LE: loop exit
PB: predicated region body
PF: predicated region fallthrough
CT: control target
= control target key end

     0   :  { %6 = vsyncpa [#allocation3], 0  ;;  %s128_s0 = inlined_call_operand.hbm [shape: f32[8,512], index: 0, kind: input, shape index: {}]   ;;  %s129_s1 = inlined_call_operand.hbm [shape: f32[8,512], index: 1, kind: output, shape index: {}]  }
   0x1   :  { %7 = vsyncpa [#allocation4], 0  ;;  %s13_s8 = sshll.u32 %s128_s0, 4  ;;  %s110_s9 = smov [#allocation2]   ;;  %s14_s8 = int_to_ptr.hbm [resolvable:$true] %s13_s8 }
   0x2   :  { %s15_s10 = sshll.u32 %s110_s9, 4  ;;  %s16_s10 = int_to_ptr.vmem [resolvable:$true] %s15_s10 }
   0x3   :  { %18 = dma.hbm_to_vmem [thread:$0]  %s14_s8, 512, %s16_s10, [#allocation3]  }
   0x4   :  { %106 = dma.done.wait [#allocation3], 512  }
   0x5   :  { %107 = vsyncadd [#allocation3], 4294966784  ;;  %v23_v0 = vld [vmem:[#allocation2] sm:$0xff]  ;;  %v24_v1 = vld [vmem:[#allocation2 + $0x8] sm:$0xff]  ;;  %s111_s11 = smov [#allocation5]   ;;  %s46_s14 = sshll.u32 %s129_s1, 4  ;;  %s47_s14 = int_to_ptr.hbm [resolvable:$true] %s46_s14 }
   0x6   :  { %v25_v2 = vld [vmem:[#allocation2 + $0x10] sm:$0xff]  ;;  %v27_v3 = vadd.f32 %v23_v0, %v23_v0  ;;  %v28_v4 = vadd.f32 %v24_v1, %v24_v1  ;;  %v26_v6 = vld [vmem:[#allocation2 + $0x18] sm:$0xff]  ;;  %s44_s0 = sshll.u32 %s111_s11, 4  ;;  %s45_s0 = int_to_ptr.vmem [resolvable:$true] %s44_s0 }
   0x7   :  { %v29_v5 = vadd.f32 %v25_v2, %v25_v2  ;;  %v30_v7 = vadd.f32 %v26_v6, %v26_v6 }
   0x8   :  { %v31_v8 = vadd.f32 2.0, %v27_v3  ;;  %v32_v9 = vadd.f32 2.0, %v28_v4 }
   0x9   :  { %v33_v10 = vadd.f32 2.0, %v29_v5  ;;  %v34_v11 = vadd.f32 2.0, %v30_v7 }
   0xa   :  { %35 = vst [vmem:[#allocation5] sm:$0xff] %v31_v8 }
   0xb   :  { %36 = vst [vmem:[#allocation5 + $0x8] sm:$0xff] %v32_v9 }
   0xc   :  { %37 = vst [vmem:[#allocation5 + $0x10] sm:$0xff] %v33_v10 }
   0xd   :  { %38 = vst [vmem:[#allocation5 + $0x18] sm:$0xff] %v34_v11 }
   0xe   :  { %49 = dma.vmem_to_hbm [thread:$0]  %s45_s0, 512, %s47_s14, [#allocation4]  }
   0xf   :  { %108 = dma.done.wait [#allocation4], 512  }
  0x10   :  { %109 = vsyncadd [#allocation4], 4294966784 }
  0x11   :  { %54 = vsyncpa [#allocation3], 1 }
  0x12   :  { %55 = vsyncpa [#allocation4], 1 }

</bundles_post_ra>
